<compile_context>
chip_gen: v5e
topology: v5e:2x2
jax: 0.10.0
libtpu: 0.0.40
codegen_flags: <defaults>
</compile_context>

<pallas_src>
import jax
import jax.numpy as jnp
from jax.experimental import pallas as pl
from jax.experimental.pallas import tpu as pltpu


def ingredient_encoder_kernel(ids_ref, emb_ref, out_ref):
    """Sum of gathered embedding rows via one-hot MXU matmul.

    ids_ref: (N_pad, 1) int32 in VMEM (padded with -1, which matches no row)
    emb_ref: (V, D)     f32   in VMEM (whole embedding table)
    out_ref: (1, D)     f32   in VMEM
    """
    n_pad = ids_ref.shape[0]
    v = emb_ref.shape[0]

    ids = ids_ref[...]                                              # (N_pad, 1)
    iota = jax.lax.broadcasted_iota(jnp.int32, (n_pad, v), 1)       # (N_pad, V)
    onehot = (ids == iota).astype(emb_ref.dtype)                    # (N_pad, V)

    # Single MXU pass: (N_pad, V) @ (V, D) -> (N_pad, D), f32 accumulation.
    gathered = jnp.dot(onehot, emb_ref[...],
                       preferred_element_type=jnp.float32)

    # Cross-sublane reduction over the id axis (XLU), lane-dense (1, D) store.
    out_ref[...] = jnp.sum(gathered, axis=0, keepdims=True)


def ingredient_encoder(ingredient_ids, embedding_table):
    """ingredient_ids: (N,) int; embedding_table: (V, D) f32 -> (D,) f32."""
    n = ingredient_ids.shape[0]
    v, d = embedding_table.shape

    # Pad the id list to a multiple of 8 (vreg sublanes); -1 never matches iota
    # so padded rows contribute exactly zero.
    n_pad = max(8, pl.cdiv(n, 8) * 8)
    ids = ingredient_ids.astype(jnp.int32)
    ids = jnp.pad(ids, (0, n_pad - n), constant_values=-1).reshape(n_pad, 1)
    emb = embedding_table.astype(jnp.float32)

    out = pl.pallas_call(
        ingredient_encoder_kernel,
        out_shape=jax.ShapeDtypeStruct((1, d), jnp.float32),
        grid=(1,),
        in_specs=[
            pl.BlockSpec((n_pad, 1), lambda i: (0, 0)),   # ids (tiny, VMEM)
            pl.BlockSpec((v, d), lambda i: (0, 0)),       # whole table, one DMA
        ],
        out_specs=pl.BlockSpec((1, d), lambda i: (0, 0)),
        compiler_params=pltpu.CompilerParams(
            dimension_semantics=("arbitrary",),
        ),
    )(ids, emb)
    return out.reshape(d)


if __name__ == "__main__":
    key = jax.random.PRNGKey(0)
    k_emb, k_ids = jax.random.split(key)

    VOCAB = 128        # ingredient_vocab_size
    DIM = 128          # embedding_dim
    N_IDS = 8          # number of ingredient ids in the input sequence

    # nn.Embedding default init ~ N(0, 1)
    embedding_table = jax.random.normal(k_emb, (VOCAB, DIM), dtype=jnp.float32)
    ingredient_ids = jax.random.randint(k_ids, (N_IDS,), 0, VOCAB, dtype=jnp.int32)

    out = ingredient_encoder(ingredient_ids, embedding_table)
    out = jax.block_until_ready(out)

    # Pure-JAX reference (embedding lookup + sum over dim 0).
    ref = jnp.sum(embedding_table[ingredient_ids], axis=0)
    assert out.shape == (DIM,)
    assert jnp.allclose(out, ref, atol=1e-5, rtol=1e-5)

    print("KERNEL_OK")
</pallas_src>

<mosaic_0001>
module attributes {stable_mosaic.version = 11 : i64} {
  func.func @ingredient_encoder_kernel(%arg0: i32, %arg1: memref<8x1xi32, #tpu.memory_space<vmem>>, %arg2: memref<128x128xf32, #tpu.memory_space<vmem>>, %arg3: memref<1x128xf32, #tpu.memory_space<vmem>>) attributes {dimension_semantics = [#tpu.dimension_semantics<arbitrary>], iteration_bounds = array<i64: 1>, scalar_prefetch = 0 : i64, scratch_operands = 0 : i64, tpu.core_type = #tpu.core_type<tc>, window_params = [{pipeline_mode = #tpu.pipeline_mode<synchronous>, transform_indices = @transform_0, window_bounds = array<i64: 8, 1>}, {pipeline_mode = #tpu.pipeline_mode<synchronous>, transform_indices = @transform_1, window_bounds = array<i64: 128, 128>}, {pipeline_mode = #tpu.pipeline_mode<synchronous>, transform_indices = @transform_2, window_bounds = array<i64: 1, 128>}]} {
    %c0 = arith.constant 0 : index
    %c0_0 = arith.constant 0 : index
    %0 = vector.load %arg1[%c0, %c0_0] : memref<8x1xi32, #tpu.memory_space<vmem>>, vector<8x1xi32>
    %1 = tpu.iota {dimensions = array<i32: 1>} : vector<8x128xi32>
    %2 = vector.broadcast %0 : vector<8x1xi32> to vector<8x128xi32>
    %3 = arith.cmpi eq, %2, %1 : vector<8x128xi32>
    %4 = arith.extui %3 : vector<8x128xi1> to vector<8x128xi32>
    %5 = arith.sitofp %4 : vector<8x128xi32> to vector<8x128xf32>
    %c0_1 = arith.constant 0 : index
    %c0_2 = arith.constant 0 : index
    %6 = vector.load %arg2[%c0_1, %c0_2] : memref<128x128xf32, #tpu.memory_space<vmem>>, vector<128x128xf32>
    %cst = arith.constant dense<0.000000e+00> : vector<8x128xf32>
    %7 = tpu.matmul %5, %6, %cst {dimension_numbers = #tpu.dot_dimension_numbers<[1], [0], [0], [1], [0, 0, 1, 1], [], []>} : vector<8x128xf32>, vector<128x128xf32>, vector<8x128xf32> -> vector<8x128xf32>
    %cst_3 = arith.constant dense<0.000000e+00> : vector<128xf32>
    %8 = vector.multi_reduction <add>, %7, %cst_3 [0] : vector<8x128xf32> to vector<128xf32>
    %9 = vector.shape_cast %8 : vector<128xf32> to vector<1x128xf32>
    %c0_4 = arith.constant 0 : index
    %c0_5 = arith.constant 0 : index
    %10 = vector.load %arg3[%c0_4, %c0_5] : memref<1x128xf32, #tpu.memory_space<vmem>>, vector<1x128xf32>
    tpu.vector_store %arg3[%c0_4, %c0_5], %9 {strides = array<i32>} : memref<1x128xf32, #tpu.memory_space<vmem>>, vector<1x128xf32>,
    return
  }
  func.func @transform_0(%arg0: i32) -> (i32, i32) {
    %c0_i32 = arith.constant 0 : i32
    %c0_i32_0 = arith.constant 0 : i32
    %c0_i32_1 = arith.constant 0 : i32
    return %c0_i32, %c0_i32_0 : i32, i32
  }
  func.func @transform_1(%arg0: i32) -> (i32, i32) {
    %c0_i32 = arith.constant 0 : i32
    %c0_i32_0 = arith.constant 0 : i32
    %c0_i32_1 = arith.constant 0 : i32
    return %c0_i32, %c0_i32_0 : i32, i32
  }
  func.func @transform_2(%arg0: i32) -> (i32, i32) {
    %c0_i32 = arith.constant 0 : i32
    %c0_i32_0 = arith.constant 0 : i32
    %c0_i32_1 = arith.constant 0 : i32
    return %c0_i32, %c0_i32_0 : i32, i32
  }
}

</mosaic_0001>

<bundles_post_ra>
// kernel: tpu_custom_call.1
= control target key start
LH: loop header
LB: loop body
LE: loop exit
PB: predicated region body
PF: predicated region fallthrough
CT: control target
= control target key end

     0   :  { %7 = vsyncpa [#allocation3], 0  ;;  %s188_s0 = inlined_call_operand.vmem [shape: s32[8,1], index: 0, kind: input, shape index: {}]   ;;  %s189_s1 = inlined_call_operand.hbm [shape: f32[128,128], index: 1, kind: input, shape index: {}]   ;;  %s190_s2 = inlined_call_operand.hbm [shape: f32[1,128], index: 2, kind: output, shape index: {}]  }
   0x1   :  { %8 = vsyncpa [#allocation4], 0  ;;  %s15_s11 = sshll.u32 %s189_s1, 4  ;;  %s158_s12 = smov [#allocation2]   ;;  %s16_s11 = int_to_ptr.hbm [resolvable:$true] %s15_s11 }
   0x2   :  { %s17_s13 = sshll.u32 %s158_s12, 4  ;;  %s159_s14 = smov 128   ;;  %s18_s13 = int_to_ptr.vmem [resolvable:$true] %s17_s13 }
   0x3   :  { %s160_s15 = smov 8  }
   0x4   :  { %23 = dma.hbm_to_vmem [thread:$0]  %s16_s11, 2048, %s18_s13, [#allocation3], %s159_s14, %s159_s14, %s160_s15  }
   0x5   :  { %154 = dma.done.wait [#allocation3], 2048  }
   0x6   :  { %155 = vsyncadd [#allocation3], 4294965248  ;;  %v161_v0 = vmov 0   ;;  %v28_v1 = vld [vmem:[%s188_s0] sm:$0xff]  ;;  %v52_v2 = vld [vmem:[#allocation2 + $0x78] sm:$0xff]  ;;  %v29_v18 = vlaneseq  ;;  %v162_v21 = vmov 1.0  }
   0x7   :  { %105 = vset.pattern.permute.xlu0 %v161_v0  ;;  %v51_v3 = vld [vmem:[#allocation2 + $0x70] sm:$0xff]  ;;  %53 = vmatpush.msra.mxu0 %v52_v2  ;;  %v50_v4 = vld [vmem:[#allocation2 + $0x68] sm:$0xff]  ;;  %v49_v5 = vld [vmem:[#allocation2 + $0x60] sm:$0xff]  ;;  %s163_s0 = smov [#allocation5]   ;;  %s87_s20 = sshll.u32 %s190_s2, 4  ;;  %s88_s20 = int_to_ptr.hbm [resolvable:$true] %s87_s20 }
   0x8   :  { %32 = vperm.xlu0 %105, %v28_v1   ;;  %v48_v6 = vld [vmem:[#allocation2 + $0x58] sm:$0xff]  ;;  %v47_v7 = vld [vmem:[#allocation2 + $0x50] sm:$0xff]  ;;  %v46_v8 = vld [vmem:[#allocation2 + $0x48] sm:$0xff]  ;;  %v30_v19 = vand.u32 127, %v29_v18  ;;  %s85_s1 = sshll.u32 %s163_s0, 4  ;;  %s86_s1 = int_to_ptr.vmem [resolvable:$true] %s85_s1 }
   0x9   :  { %54 = vmatpush.msra.mxu0 %v51_v3  ;;  %v45_v9 = vld [vmem:[#allocation2 + $0x40] sm:$0xff]  ;;  %v44_v10 = vld [vmem:[#allocation2 + $0x38] sm:$0xff]  ;;  %v43_v11 = vld [vmem:[#allocation2 + $0x30] sm:$0xff] }
   0xa   :  { %v42_v12 = vld [vmem:[#allocation2 + $0x28] sm:$0xff]  ;;  %v41_v13 = vld [vmem:[#allocation2 + $0x20] sm:$0xff]  ;;  %v40_v14 = vld [vmem:[#allocation2 + $0x18] sm:$0xff] }
   0xb   :  { %55 = vmatpush.msra.mxu0 %v50_v4  ;;  %v39_v15 = vld [vmem:[#allocation2 + $0x10] sm:$0xff]  ;;  %v38_v16 = vld [vmem:[#allocation2 + $0x8] sm:$0xff]  ;;  %v37_v17 = vld [vmem:[#allocation2] sm:$0xff] }
   0xd   :  { %56 = vmatpush.msra.mxu0 %v49_v5 }
   0xf   :  { %57 = vmatpush.msra.mxu0 %v48_v6 }
  0x11   :  { %58 = vmatpush.msra.mxu0 %v47_v7 }
  0x13   :  { %59 = vmatpush.msra.mxu0 %v46_v8 }
  0x15   :  { %60 = vmatpush.msra.mxu0 %v45_v9 }
  0x17   :  { %61 = vmatpush.msra.mxu0 %v44_v10 }
  0x19   :  { %62 = vmatpush.msra.mxu0 %v43_v11 }
  0x1b   :  { %63 = vmatpush.msra.mxu0 %v42_v12 }
  0x1d   :  { %64 = vmatpush.msra.mxu0 %v41_v13 }
  0x1f   :  { %65 = vmatpush.msra.mxu0 %v40_v14 }
  0x21   :  { %66 = vmatpush.msra.mxu0 %v39_v15 }
  0x23   :  { %67 = vmatpush.msra.mxu0 %v38_v16 }
  0x25   :  { %68 = vmatpush.msra.mxu0 %v37_v17 }
  0x7a   :  { %v33_v20 = vpop.permute.xlu0 %32 }
  0x7b   :  { %vm34_vm0 = vcmp.eq.s32.totalorder %v33_v20, %v30_v19 }
  0x7c   :  { %98 = vmatmul.msk.f32.vlgmr.msra.gmra.mxu0 %vm34_vm0, %v162_v21 }
  0xf9   :  { %v70_v22 = vpop.f32.mrf.mxu0 }
  0xfa   :  { %v73_v23 = vrot.slane %v70_v22, 4 }
  0xfc   :  { %v74_v24 = vadd.f32 %v73_v23, %v70_v22 }
  0xfe   :  { %v75_v25 = vrot.slane %v74_v24, 2 }
 0x100   :  { %v76_v26 = vadd.f32 %v75_v25, %v74_v24 }
 0x102   :  { %v77_v27 = vrot.slane %v76_v26, 1 }
 0x104   :  { %v78_v28 = vadd.f32 %v77_v27, %v76_v26 }
 0x106   :  { %79 = vst [vmem:[#allocation5] sm:$0x1] %v78_v28 }
 0x107   :  { %90 = dma.vmem_to_hbm [thread:$0]  %s86_s1, 16, %s88_s20, [#allocation4]  }
 0x108   :  { %156 = dma.done.wait [#allocation4], 16  }
 0x109   :  { %157 = vsyncadd [#allocation4], 4294967280 }
 0x10a   :  { %95 = vsyncpa [#allocation3], 1 }
 0x10b   :  { %96 = vsyncpa [#allocation4], 1 }

</bundles_post_ra>
